<compile_context>
chip_gen: v5e
topology: v5e:2x2
jax: 0.10.0
libtpu: 0.0.40
codegen_flags: <defaults>
</compile_context>

<pallas_src>
import math

import jax
import jax.numpy as jnp
from jax.experimental import pallas as pl
from jax.experimental.pallas import tpu as pltpu


def token_embedding_kernel(x_ref, w_ref, o_ref):
    # x_ref: (1, TL, 3C)  fused [prev | cur | next] rows for one L-tile
    # w_ref: (3C, D_pad)  stacked per-tap weights (zero-padded lanes)
    # o_ref: (1, TL, D_pad)
    o_ref[0] = jnp.dot(
        x_ref[0], w_ref[...], preferred_element_type=jnp.float32
    ).astype(o_ref.dtype)


def _choose_tile_l(L, c3, d_pad, itemsize, budget_bytes=20 << 20):
    """Pick an L-tile (multiple of 8) whose double-buffered in+out tiles fit
    the budget on every TPU generation (v7x has only 64 MiB VMEM)."""
    per_row = 2 * (c3 + d_pad) * itemsize          # 2x: double buffering
    tl = budget_bytes // max(per_row, 1)
    tl = min(tl, 2048)                             # amortize ~0.35us/step overhead
    tl = max(8 * (tl // 8), 8)
    return L if L <= tl else tl


def token_embedding(x, conv_weight):
    """x: (B, L, cIn); conv_weight: (dModel, cIn, 3). Returns (B, L, dModel)."""
    B, L, C = x.shape
    D = conv_weight.shape[0]
    itemsize = jnp.dtype(x.dtype).itemsize

    # Single pre-pass over x: fused shifted copies (circular wrap via roll).
    x_cat = jnp.concatenate(
        [jnp.roll(x, 1, axis=1), x, jnp.roll(x, -1, axis=1)], axis=-1)  # (B,L,3C)

    # Stacked per-tap weights (3C, D); pad D to a multiple of 128 so output
    # stores are full-lane (unmasked).
    w_cat = jnp.concatenate(
        [conv_weight[:, :, k].T for k in range(3)], axis=0)             # (3C, D)
    D_pad = 128 * pl.cdiv(D, 128)
    if D_pad != D:
        w_cat = jnp.pad(w_cat, ((0, 0), (0, D_pad - D)))

    C3 = 3 * C
    TL = _choose_tile_l(L, C3, D_pad, itemsize)
    grid = (B, pl.cdiv(L, TL))

    # Explicit VMEM budget: double-buffered tiles + weights + headroom.
    vmem_need = 2 * TL * (C3 + D_pad) * itemsize + 2 * C3 * D_pad * itemsize
    vmem_limit = int(min(max(vmem_need + (4 << 20), 32 << 20), 48 << 20))

    out_p = pl.pallas_call(
        token_embedding_kernel,
        out_shape=jax.ShapeDtypeStruct((B, L, D_pad), x.dtype),
        grid_spec=pltpu.PrefetchScalarGridSpec(
            num_scalar_prefetch=0,
            grid=grid,
            in_specs=[
                pl.BlockSpec((1, TL, C3), lambda b, l: (b, l, 0)),
                pl.BlockSpec((C3, D_pad), lambda b, l: (0, 0)),
            ],
            out_specs=pl.BlockSpec((1, TL, D_pad), lambda b, l: (b, l, 0)),
        ),
        compiler_params=pltpu.CompilerParams(
            dimension_semantics=("parallel", "parallel"),
            vmem_limit_bytes=vmem_limit),
    )(x_cat, w_cat)

    return out_p if D_pad == D else out_p[:, :, :D]


def reference(x, conv_weight):
    """Pure-JAX reference of the circular Conv1d forward (for verification)."""
    w0 = conv_weight[:, :, 0].T
    w1 = conv_weight[:, :, 1].T
    w2 = conv_weight[:, :, 2].T
    x_prev = jnp.roll(x, 1, axis=1)
    x_next = jnp.roll(x, -1, axis=1)
    return x_prev @ w0 + x @ w1 + x_next @ w2


if __name__ == "__main__":
    B, L, C_IN, D_MODEL = 2, 8, 4, 32

    key = jax.random.PRNGKey(0)
    kx, kw = jax.random.split(key)

    # Input in (B, L, cIn) layout (what the PyTorch forward is called with
    # before its .permute(0, 2, 1)); output matches its .transpose(1, 2).
    x = jax.random.normal(kx, (B, L, C_IN), dtype=jnp.float32)

    # kaiming_normal_(mode='fan_in', nonlinearity='leaky_relu'):
    #   gain = sqrt(2 / (1 + 0.01^2)), fan_in = cIn * kernel_size
    fan_in = C_IN * 3
    gain = math.sqrt(2.0 / (1.0 + 0.01 ** 2))
    std = gain / math.sqrt(fan_in)
    conv_weight = std * jax.random.normal(kw, (D_MODEL, C_IN, 3), dtype=jnp.float32)

    out = token_embedding(x, conv_weight)
    out = jax.block_until_ready(out)

    ref = reference(x, conv_weight)
    assert out.shape == (B, L, D_MODEL)
    assert jnp.allclose(out, ref, atol=1e-5, rtol=1e-5), "mismatch vs reference"

    print("KERNEL_OK")
</pallas_src>

<mosaic_0001>
module attributes {stable_mosaic.version = 11 : i64} {
  func.func @token_embedding_kernel(%arg0: i32, %arg1: i32, %arg2: memref<1x8x12xf32, #tpu.memory_space<vmem>>, %arg3: memref<12x128xf32, #tpu.memory_space<vmem>>, %arg4: memref<1x8x128xf32, #tpu.memory_space<vmem>>) attributes {dimension_semantics = [#tpu.dimension_semantics<parallel>, #tpu.dimension_semantics<parallel>], iteration_bounds = array<i64: 2, 1>, scalar_prefetch = 0 : i64, scratch_operands = 0 : i64, tpu.core_type = #tpu.core_type<tc>, window_params = [{transform_indices = @transform_0, window_bounds = array<i64: 1, 8, 12>}, {pipeline_mode = #tpu.pipeline_mode<synchronous>, transform_indices = @transform_1, window_bounds = array<i64: 12, 128>}, {transform_indices = @transform_2, window_bounds = array<i64: 1, 8, 128>}]} {
    %c0 = arith.constant 0 : index
    %c0_0 = arith.constant 0 : index
    %c0_1 = arith.constant 0 : index
    %0 = vector.load %arg2[%c0, %c0_0, %c0_1] : memref<1x8x12xf32, #tpu.memory_space<vmem>>, vector<1x8x12xf32>
    %1 = vector.shape_cast %0 : vector<1x8x12xf32> to vector<8x12xf32>
    %c0_2 = arith.constant 0 : index
    %c0_3 = arith.constant 0 : index
    %2 = vector.load %arg3[%c0_2, %c0_3] : memref<12x128xf32, #tpu.memory_space<vmem>>, vector<12x128xf32>
    %cst = arith.constant dense<0.000000e+00> : vector<8x128xf32>
    %3 = tpu.matmul %1, %2, %cst {dimension_numbers = #tpu.dot_dimension_numbers<[1], [0], [0], [1], [0, 0, 1, 1], [], []>} : vector<8x12xf32>, vector<12x128xf32>, vector<8x128xf32> -> vector<8x128xf32>
    %c0_4 = arith.constant 0 : index
    %c0_5 = arith.constant 0 : index
    %c0_6 = arith.constant 0 : index
    %4 = vector.load %arg4[%c0_4, %c0_5, %c0_6] : memref<1x8x128xf32, #tpu.memory_space<vmem>>, vector<1x8x128xf32>
    %5 = vector.shape_cast %4 : vector<1x8x128xf32> to vector<8x128xf32>
    %6 = vector.shape_cast %3 : vector<8x128xf32> to vector<1x8x128xf32>
    tpu.vector_store %arg4[%c0_4, %c0_5, %c0_6], %6 {strides = array<i32>} : memref<1x8x128xf32, #tpu.memory_space<vmem>>, vector<1x8x128xf32>,
    return
  }
  func.func @transform_0(%arg0: i32, %arg1: i32) -> (i32, i32, i32) {
    %c0_i32 = arith.constant 0 : i32
    %c0_i32_0 = arith.constant 0 : i32
    return %arg0, %arg1, %c0_i32 : i32, i32, i32
  }
  func.func @transform_1(%arg0: i32, %arg1: i32) -> (i32, i32) {
    %c0_i32 = arith.constant 0 : i32
    %c0_i32_0 = arith.constant 0 : i32
    %c0_i32_1 = arith.constant 0 : i32
    return %c0_i32, %c0_i32_0 : i32, i32
  }
  func.func @transform_2(%arg0: i32, %arg1: i32) -> (i32, i32, i32) {
    %c0_i32 = arith.constant 0 : i32
    %c0_i32_0 = arith.constant 0 : i32
    return %arg0, %arg1, %c0_i32 : i32, i32, i32
  }
}

</mosaic_0001>

<bundles_post_ra>
// kernel: tpu_custom_call.1
= control target key start
LH: loop header
LB: loop body
LE: loop exit
PB: predicated region body
PF: predicated region fallthrough
CT: control target
= control target key end

     0   :  { %7 = vsyncpa [#allocation3], 0  ;;  %s735_s0 = inlined_call_operand.hbm [shape: f32[2,8,12], index: 0, kind: input, shape index: {}]   ;;  %s736_s1 = inlined_call_operand.hbm [shape: f32[12,128], index: 1, kind: input, shape index: {}]   ;;  %s737_s2 = inlined_call_operand.hbm [shape: f32[2,8,128], index: 2, kind: output, shape index: {}]  }
   0x1   :  { %9 = vsyncpa [#allocation3 + $0x1], 0 }
   0x2   :  { %10 = vsyncpa [#allocation6], 0 }
   0x3   :  { %11 = vsyncpa [#allocation4], 0 }
   0x4   :  { %13 = vsyncpa [#allocation4 + $0x1], 0  ;;  %s592_s9 = smov 0   ;;  %s594_s10 = smov 0  }
   0x5   :  { %s596_s11 = smov 0   ;;  %s598_s12 = smov 0  }
   0x6   :  { %s600_s13 = smov 0   ;;  %s602_s14 = smov 0  }
   0x7 LB: > { %s334_s15 = sadd.s32 4294967295, %s572_s14   ;;  %p336_p0 = scmp.ge.s32.totalorder %s572_s14, 1  ;;  %s572_s14 = sphi %s602_s14, %s19_s14   ;;  %s568_s13 = sphi %s600_s13, %s748_s13   ;;  %s564_s12 = sphi %s598_s12, %s747_s12   ;;  %s560_s11 = sphi %s596_s11, %s746_s11   ;;  %s556_s10 = sphi %s594_s10, %s745_s10   ;;  %s552_s9 = sphi %s592_s9, %s744_s9  }
   0x8   : > { %p624_p1 = scmp.eq.s32.totalorder %s334_s15, 0  ;;  %p113_p2 = scmp.lt.s32.totalorder %s572_s14, 3 }
   0x9   : > { %s124_s19 = sshll.u32 %s736_s1, 4  ;;  %s574_s21 = smov [#allocation5]   ;;  %s125_s19 = int_to_ptr.hbm [resolvable:$true] %s124_s19 }
   0xa   : > { %p632_p3 = pnand %p336_p0, %p113_p2  ;;  %s126_s22 = sshll.u32 %s574_s21, 4  ;;  %s127_s22 = int_to_ptr.vmem [resolvable:$true] %s126_s22 }
   0xb   : > { %p338_p6 = scmp.ge.s32.totalorder %s572_s14, 2  ;;  %s575_s23 = smov 128  }
   0xc   : > { %p359_p4 = pneg %p632_p3  ;;  %s576_s24 = smov 8  }
   0xd   : > { %s335_s25 = sadd.s32 4294967294, %s572_s14   ;;  %s31_s26 = sadd.s32 1, %s568_s13 }
   0xe   : > { %p360_p5 = pnand %p359_p4, %p624_p1  ;;  %s40_s27 = sadd.s32 1, %s560_s11 }
   0xf   : > { %p33_p7 = scmp.ge.s32.totalorder %s31_s26, 2  ;;  %p47_p8 = scmp.ne.s32.totalorder %s560_s11, %s556_s10 }
  0x10   : > { %362 = dma.hbm_to_vmem [thread:$0]  (!%p360_p5), %s125_s19, 256, %s127_s22, [#allocation6], %s575_s23, %s575_s23, %s576_s24  }
  0x11   : > { %p48_p9 = scmp.eq.s32.totalorder %s572_s14, 0  ;;  %p53_p10 = scmp.ne.s32.totalorder %s556_s10, %s552_s9 }
  0x12   : > { %s750_s26 = smov (%p33_p7, %s31_s26), 0  ;;  %p100_p13 = scmp.eq.s32.totalorder %s334_s15, 1 }
  0x13   : > { %p651_p11 = por %p48_p9, %p47_p8  ;;  %p657_p12 = por %p624_p1, %p53_p10 }
  0x14   : > { %s35_s30 = ssub.s32 %s568_s13, %s750_s26  ;;  %p106_p2 = scmp.eq.s32.totalorder %s335_s25, 1 }
  0x15   : > { %p38_p0 = scmp.eq.s32.totalorder %s35_s30, 0  ;;  %p663_p4 = por %p100_p13, %p47_p8 }
  0x16   : > { %p372_p5 = scmp.lt.s32.totalorder %s572_s14, 2  ;;  %p671_p7 = por %p106_p2, %p53_p10 }
  0x17   : > { %s669_s4 = scalar_select %p38_p0, %s560_s11, %s40_s27  }
  0x18   : > { %s140_s6 = sand.u32 1, %s560_s11   ;;  %s340_s8 = sshll.u32 %s568_s13, 3 }
  0x19   : > { %s339_s7 = sshll.u32 %s140_s6, 3  ;;  %s149_s15 = scalar_lea.hbm %s735_s0, %s340_s8 }
  0x1a   : > { %s144_s19 = scalar_lea.vmem [#allocation2], %s339_s7  ;;  %s151_s22 = sshll.u32 %s149_s15, 4  ;;  %s152_s22 = int_to_ptr.hbm [resolvable:$true] %s151_s22 }
  0x1b   : > { %s153_s21 = sshll.u32 %s144_s19, 4  ;;  %p364_p8 = pnand %p372_p5, %p651_p11  ;;  %s154_s21 = int_to_ptr.vmem [resolvable:$true] %s153_s21 }
  0x1c   : > { %s141_s23 = scalar_lea.sflag [#allocation3], %s140_s6  ;;  %162 = sbr.rel (%p632_p3) target bundleno = 169 (0xa9), region = 28 }
  0x1d   : > { %366 = dma.hbm_to_vmem [thread:$0]  (!%p364_p8), %s152_s22, 128, %s154_s21, %s141_s23  }
  0x1e   : > { %s685_s24 = sand.u32 (!%p632_p3), 1, %s556_s10  }
  0x1f   : > { %s342_s25 = sshll.u32 (!%p632_p3), %s685_s24, 3  ;;  %s165_s27 = scalar_lea.sflag (!%p632_p3), [#allocation3], %s685_s24 }
  0x20   : > { %s168_s30 = scalar_lea.vmem (!%p632_p3), [#allocation2], %s342_s25 }
  0x21   : > { %539 = dma.done.wait (%p657_p12), %s165_s27, 128  }
  0x22   : > { %541 = vsyncadd (%p657_p12), %s165_s27, 4294967168 }
  0x23   : > { %543 = dma.done.wait (%p624_p1), [#allocation6], 256  }
  0x24   : > { %545 = vsyncadd (%p624_p1), [#allocation6], 4294967040  ;;  %vm202_vm0 = vcmask 1043456   ;;  %v197_v0 = vld [vmem:[#allocation5 + $0x8] sm:$0xf]  ;;  %v196_v1 = vld [vmem:[#allocation5] sm:$0xff] }
  0x25   : > { %345 = vmatpush.msk.msra.mxu0 %vm202_vm0, %v197_v0  ;;  %v195_v2 = vld [vmem:[%s168_s30] sm:$0xff]  ;;  %vm198_vm1 = vcmask 97280   ;;  %s348_s20 = sshll.u32 %s564_s12, 3  ;;  %s194_s7 = scalar_lea.vmem [#allocation7], %s342_s25 }
  0x26   : > { %s239_s6 = scalar_lea.hbm %s737_s2, %s348_s20  ;;  %s241_s8 = sshll.u32 %s194_s7, 4  ;;  %s242_s8 = int_to_ptr.vmem [resolvable:$true] %s241_s8 }
  0x27   : > { %221 = vmatpush.msra.mxu0 %v196_v1  ;;  %s243_s16 = sshll.u32 %s239_s6, 4  ;;  %s228_s17 = scalar_lea.sflag [#allocation4], %s685_s24  ;;  %s244_s16 = int_to_ptr.hbm [resolvable:$true] %s243_s16 }
  0x28   : > { %346 = vmatmul.msk.f32.vlgmr.msra.gmra.mxu0 %vm198_vm1, %v195_v2  ;;  %s500_s18 = sshra.s32 %s244_s16, 4  ;;  %s506_s21 = scalar_lea.hbm %s737_s2, 16  ;;  %s501_s18 = int_to_ptr.hbm [resolvable:$true] %s500_s18 }
  0x29   : > { %s502_s15 = scalar_lea.hbm %s501_s18, 8  ;;  %p507_p10 = scmp.lt.s32.totalorder %s501_s18, %s737_s2 }
  0x2a   : > { %p503_p1 = scmp.ne.s32.totalorder %s501_s18, %s502_s15  ;;  %p508_p11 = scmp.lt.s32.totalorder %s506_s21, %s502_s15 }
  0x2c   : > { %p504_p3 = pnand %p503_p1, %p663_p4  ;;  %p509_p12 = por %p508_p11, %p507_p10 }
  0x2e   : > { %p505_p9 = pneg %p504_p3 }
  0x30   : > { %p510_p13 = pnand %p509_p12, %p505_p9 }
  0xa5   : > { %v223_v3 = vpop.f32.mrf.mxu0 }
  0xa6   : > { %226 = vst [vmem:[%s194_s7] sm:$0xff] %v223_v3 }
  0xa7   : > { %513 = shalt.err (!%p510_p13)
}
  0xa8   : > { %357 = dma.vmem_to_hbm [thread:$0]  (%p663_p4), %s242_s8, 128, %s244_s16, %s228_s17  }
  0xa9 PF: > { %s255_s24 = sand.u32 1, %s552_s9   ;;  %p368_p0 = pnand %p338_p6, %p671_p7 }
  0xaa   : > { %s256_s25 = scalar_lea.sflag [#allocation4], %s255_s24 }
  0xab   : > { %p369_p2 = pneg %p368_p0 }
  0xad   : > { %547 = dma.done.wait (%p369_p2), %s256_s25, 128  }
  0xae   : > { %549 = vsyncadd (%p369_p2), %s256_s25, 4294967168  ;;  %s19_s14 = sadd.s32 1, %s572_s14   ;;  %s744_s9 = smov %s556_s10 }
  0xaf   : > { %p16_p5 = scmp.ge.s32.totalorder %s19_s14, 4   ;;  %s745_s10 = smov %s560_s11 }
  0xb0   : > { %s746_s11 = smov %s669_s4  ;;  %s747_s12 = smov %s568_s13 }
  0xb1   : > { %s748_s13 = smov %s750_s26  ;;  %18 = sbr.rel (!%p16_p5) target bundleno = 7 (0x7), region = 77 }
  0xb6   :  { %262 = vsyncpa [#allocation3], 1 }
  0xb7   :  { %264 = vsyncpa [#allocation3 + $0x1], 1 }
  0xb8   :  { %265 = vsyncpa [#allocation6], 1 }
  0xb9   :  { %266 = vsyncpa [#allocation4], 1 }
  0xba   :  { %268 = vsyncpa [#allocation4 + $0x1], 1 }

</bundles_post_ra>
